<compile_context>
chip_gen: v7x
topology: tpu7x:2x2x1
jax: 0.10.0
libtpu: 0.0.40
codegen_flags: <defaults>
</compile_context>

<pallas_src>
import functools

import numpy as np
import jax
import jax.numpy as jnp
from jax.experimental import pallas as pl
from jax.experimental.pallas import tpu as pltpu


def _bilinear_matrix(out_size: int, in_size: int) -> jnp.ndarray:
    """Dense [out_size, in_size] 1-D interpolation matrix matching
    torch.nn.functional.interpolate(mode='bilinear', align_corners=False)."""
    if out_size == in_size:
        return jnp.eye(out_size, dtype=jnp.float32)
    scale = in_size / out_size
    i = np.arange(out_size, dtype=np.float64)
    src = (i + 0.5) * scale - 0.5
    src = np.maximum(src, 0.0)                       # PyTorch clamps negatives to 0
    i0 = np.minimum(np.floor(src).astype(np.int64), in_size - 1)
    i1 = np.minimum(i0 + 1, in_size - 1)
    w1 = src - i0
    w0 = 1.0 - w1
    mat = np.zeros((out_size, in_size), dtype=np.float64)
    mat[np.arange(out_size), i0] += w0
    mat[np.arange(out_size), i1] += w1               # i1 may equal i0 at the edge
    return jnp.asarray(mat, dtype=jnp.float32)


def _resize_norm_kernel(x_ref, wh_ref, wwt_ref, o_ref, *, h_first):
    # x_ref:   [H_in, W_in]   (one channel plane; B and C dims squeezed)
    # wh_ref:  [H_out, H_in]  bf16, includes the folded 2x of the normalize
    # wwt_ref: [W_in, W_out]  bf16
    # o_ref:   [H_out, W_out]
    x = x_ref[...].astype(jnp.bfloat16)              # cast in VMEM, not in HBM
    wh = wh_ref[...]
    wwt = wwt_ref[...]
    if h_first:
        t = jnp.dot(wh, x, preferred_element_type=jnp.float32)       # [H_out, W_in]
        y = jnp.dot(t.astype(jnp.bfloat16), wwt,
                    preferred_element_type=jnp.float32)              # [H_out, W_out]
    else:
        t = jnp.dot(x, wwt, preferred_element_type=jnp.float32)      # [H_in, W_out]
        y = jnp.dot(wh, t.astype(jnp.bfloat16),
                    preferred_element_type=jnp.float32)              # [H_out, W_out]
    # Normalize(mean=0.5, std=0.5) == 2*x - 1; the 2x lives in wh already.
    o_ref[...] = (y - 1.0).astype(o_ref.dtype)


def siglip_processor(x, size, out_dtype=None):
    """x: [B, C, H, W] image batch (values in [0,1]); size: int or (H_out, W_out).
    Returns [B, C, H_out, W_out] == Siglip_Processor(size)(x)."""
    B, C, H_in, W_in = x.shape
    if isinstance(size, int):
        H_out, W_out = size, size
    else:
        H_out, W_out = size
    if out_dtype is None:
        out_dtype = x.dtype if jnp.issubdtype(x.dtype, jnp.floating) else jnp.float32

    # Fold the 2x of the normalize into the H weights; store both weights as bf16.
    wh = (2.0 * _bilinear_matrix(H_out, H_in)).astype(jnp.bfloat16)   # [H_out, H_in]
    wwt = _bilinear_matrix(W_out, W_in).T.astype(jnp.bfloat16)        # [W_in, W_out]

    # Pick the cheaper contraction order (fewer FLOPs, smaller live intermediate).
    cost_h_first = H_out * W_in * (H_in + W_out)
    cost_w_first = H_in * W_out * (W_in + H_out)
    h_first = cost_h_first <= cost_w_first
    flops_per_plane = 2 * min(cost_h_first, cost_w_first)

    in_itemsize = jnp.dtype(x.dtype).itemsize
    out_itemsize = jnp.dtype(out_dtype).itemsize
    cost = pl.CostEstimate(
        flops=B * C * flops_per_plane,
        transcendentals=0,
        bytes_accessed=(B * C * H_in * W_in * in_itemsize
                        + B * C * H_out * W_out * out_itemsize
                        + 2 * (wh.size + wwt.size)),
    )

    # VMEM audit: double-buffered in/out blocks + pinned weights + f32 intermediates.
    in_blk = H_in * W_in * in_itemsize
    out_blk = H_out * W_out * out_itemsize
    w_bytes = 2 * (wh.size + wwt.size)
    inter = 4 * max(H_out * W_in, H_in * W_out)
    budget = 2 * (in_blk + out_blk + w_bytes) + 4 * inter + (2 << 20)
    vmem_limit = int(min(64 << 20, max(32 << 20, budget)))

    kernel = functools.partial(_resize_norm_kernel, h_first=h_first)

    return pl.pallas_call(
        kernel,
        out_shape=jax.ShapeDtypeStruct((B, C, H_out, W_out), out_dtype),
        grid=(B, C),
        in_specs=[
            pl.BlockSpec((None, None, H_in, W_in), lambda b, c: (b, c, 0, 0)),
            pl.BlockSpec((H_out, H_in), lambda b, c: (0, 0)),   # pinned across grid
            pl.BlockSpec((W_in, W_out), lambda b, c: (0, 0)),   # pinned across grid
        ],
        out_specs=pl.BlockSpec((None, None, H_out, W_out), lambda b, c: (b, c, 0, 0)),
        compiler_params=pltpu.CompilerParams(
            dimension_semantics=("parallel", "parallel"),
            vmem_limit_bytes=vmem_limit),
        cost_estimate=cost,
    )(x, wh, wwt)


def _reference(x, size):
    """Plain-JAX gather-based bilinear (PyTorch align_corners=False) + normalize."""
    B, C, H_in, W_in = x.shape
    H_out, W_out = size

    def src_idx(out_size, in_size):
        scale = in_size / out_size
        i = jnp.arange(out_size, dtype=jnp.float32)
        s = jnp.maximum((i + 0.5) * scale - 0.5, 0.0)
        i0 = jnp.minimum(jnp.floor(s).astype(jnp.int32), in_size - 1)
        i1 = jnp.minimum(i0 + 1, in_size - 1)
        w1 = s - i0.astype(jnp.float32)
        return i0, i1, 1.0 - w1, w1

    h0, h1, wh0, wh1 = src_idx(H_out, H_in)
    c0, c1, wc0, wc1 = src_idx(W_out, W_in)
    xh = (x[:, :, h0, :] * wh0[None, None, :, None]
          + x[:, :, h1, :] * wh1[None, None, :, None])        # [B, C, H_out, W_in]
    y = xh[:, :, :, c0] * wc0 + xh[:, :, :, c1] * wc1          # [B, C, H_out, W_out]
    return (y - 0.5) / 0.5


if __name__ == "__main__":
    key = jax.random.PRNGKey(0)
    B, C, H_in, W_in = 2, 3, 16, 16
    size = (24, 8)     # upsample rows, downsample cols -> exercises order selection

    x = jax.random.uniform(key, (B, C, H_in, W_in), jnp.float32, 0.0, 1.0)

    out = jax.block_until_ready(siglip_processor(x, size))
    ref = _reference(x, size)

    assert out.shape == (B, C, size[0], size[1])
    # bf16-in / f32-accumulate matmuls: relax tolerance vs the f32 reference.
    max_err = float(jnp.max(jnp.abs(out - ref)))
    assert max_err < 3e-2, f"mismatch vs reference, max_err={max_err}"
    print("KERNEL_OK")
</pallas_src>

<mosaic_0001>
module attributes {stable_mosaic.version = 11 : i64} {
  func.func @_resize_norm_kernel(%arg0: i32, %arg1: i32, %arg2: memref<1x1x16x16xf32, #tpu.memory_space<vmem>>, %arg3: memref<24x16xbf16, #tpu.memory_space<vmem>>, %arg4: memref<16x8xbf16, #tpu.memory_space<vmem>>, %arg5: memref<1x1x24x8xf32, #tpu.memory_space<vmem>>) attributes {dimension_semantics = [#tpu.dimension_semantics<parallel>, #tpu.dimension_semantics<parallel>], iteration_bounds = array<i64: 2, 3>, scalar_prefetch = 0 : i64, scratch_operands = 0 : i64, tpu.core_type = #tpu.core_type<tc>, window_params = [{transform_indices = @transform_0, window_bounds = array<i64: 1, 1, 16, 16>}, {pipeline_mode = #tpu.pipeline_mode<synchronous>, transform_indices = @transform_1, window_bounds = array<i64: 24, 16>}, {pipeline_mode = #tpu.pipeline_mode<synchronous>, transform_indices = @transform_2, window_bounds = array<i64: 16, 8>}, {transform_indices = @transform_3, window_bounds = array<i64: 1, 1, 24, 8>}]} {
    %c0 = arith.constant 0 : index
    %c0_0 = arith.constant 0 : index
    %c0_1 = arith.constant 0 : index
    %c0_2 = arith.constant 0 : index
    %0 = vector.load %arg2[%c0, %c0_0, %c0_1, %c0_2] : memref<1x1x16x16xf32, #tpu.memory_space<vmem>>, vector<1x1x16x16xf32>
    %1 = vector.shape_cast %0 : vector<1x1x16x16xf32> to vector<16x16xf32>
    %2 = arith.truncf %1 : vector<16x16xf32> to vector<16x16xbf16>
    %c0_3 = arith.constant 0 : index
    %c0_4 = arith.constant 0 : index
    %3 = vector.load %arg3[%c0_3, %c0_4] : memref<24x16xbf16, #tpu.memory_space<vmem>>, vector<24x16xbf16>
    %c0_5 = arith.constant 0 : index
    %c0_6 = arith.constant 0 : index
    %4 = vector.load %arg4[%c0_5, %c0_6] : memref<16x8xbf16, #tpu.memory_space<vmem>>, vector<16x8xbf16>
    %cst = arith.constant dense<0.000000e+00> : vector<16x8xf32>
    %5 = tpu.matmul %2, %4, %cst {dimension_numbers = #tpu.dot_dimension_numbers<[1], [0], [0], [1], [0, 0, 1, 1], [], []>} : vector<16x16xbf16>, vector<16x8xbf16>, vector<16x8xf32> -> vector<16x8xf32>
    %6 = arith.truncf %5 : vector<16x8xf32> to vector<16x8xbf16>
    %cst_7 = arith.constant dense<0.000000e+00> : vector<24x8xf32>
    %7 = tpu.matmul %3, %6, %cst_7 {dimension_numbers = #tpu.dot_dimension_numbers<[1], [0], [0], [1], [0, 0, 1, 1], [], []>} : vector<24x16xbf16>, vector<16x8xbf16>, vector<24x8xf32> -> vector<24x8xf32>
    %cst_8 = arith.constant 1.000000e+00 : f32
    %8 = vector.broadcast %cst_8 : f32 to vector<24x8xf32>
    %9 = arith.subf %7, %8 : vector<24x8xf32>
    %c0_9 = arith.constant 0 : index
    %c0_10 = arith.constant 0 : index
    %c0_11 = arith.constant 0 : index
    %c0_12 = arith.constant 0 : index
    %10 = vector.load %arg5[%c0_9, %c0_10, %c0_11, %c0_12] : memref<1x1x24x8xf32, #tpu.memory_space<vmem>>, vector<1x1x24x8xf32>
    %11 = vector.shape_cast %10 : vector<1x1x24x8xf32> to vector<24x8xf32>
    %12 = vector.shape_cast %9 : vector<24x8xf32> to vector<1x1x24x8xf32>
    tpu.vector_store %arg5[%c0_9, %c0_10, %c0_11, %c0_12], %12 {strides = array<i32>} : memref<1x1x24x8xf32, #tpu.memory_space<vmem>>, vector<1x1x24x8xf32>,
    return
  }
  func.func @transform_0(%arg0: i32, %arg1: i32) -> (i32, i32, i32, i32) {
    %c0_i32 = arith.constant 0 : i32
    %c0_i32_0 = arith.constant 0 : i32
    %c0_i32_1 = arith.constant 0 : i32
    return %arg0, %arg1, %c0_i32, %c0_i32_0 : i32, i32, i32, i32
  }
  func.func @transform_1(%arg0: i32, %arg1: i32) -> (i32, i32) {
    %c0_i32 = arith.constant 0 : i32
    %c0_i32_0 = arith.constant 0 : i32
    %c0_i32_1 = arith.constant 0 : i32
    return %c0_i32, %c0_i32_0 : i32, i32
  }
  func.func @transform_2(%arg0: i32, %arg1: i32) -> (i32, i32) {
    %c0_i32 = arith.constant 0 : i32
    %c0_i32_0 = arith.constant 0 : i32
    %c0_i32_1 = arith.constant 0 : i32
    return %c0_i32, %c0_i32_0 : i32, i32
  }
  func.func @transform_3(%arg0: i32, %arg1: i32) -> (i32, i32, i32, i32) {
    %c0_i32 = arith.constant 0 : i32
    %c0_i32_0 = arith.constant 0 : i32
    %c0_i32_1 = arith.constant 0 : i32
    return %arg0, %arg1, %c0_i32, %c0_i32_0 : i32, i32, i32, i32
  }
}

</mosaic_0001>

<bundles_post_ra>
// kernel: tpu_custom_call.1
= control target key start
LH: loop header
LB: loop body
LE: loop exit
PB: predicated region body
PF: predicated region fallthrough
CT: control target
= control target key end

     0   :  { %8 = vsyncpa [#allocation3], 0  ;;  %s850_s0 = inlined_call_operand.hbm [shape: f32[2,3,16,16], index: 0, kind: input, shape index: {}]   ;;  %s851_s1 = inlined_call_operand.vmem [shape: bf16[24,16], index: 1, kind: input, shape index: {}]   ;;  %s852_s2 = inlined_call_operand.vmem [shape: bf16[16,8], index: 2, kind: input, shape index: {}]   ;;  %s853_s3 = inlined_call_operand.vmem [shape: f32[2,3,24,8], index: 3, kind: output, shape index: {}]  }
   0x1   :  { %10 = vsyncpa [#allocation3 + $0x1], 0  ;;  %s690_s12 = smov 0   ;;  %s692_s13 = smov 0  }
   0x2   :  { %s694_s14 = smov 0   ;;  %s696_s15 = smov 0  }
   0x3   :  { %s698_s16 = smov 0   ;;  %s700_s17 = smov 0  }
   0x4   :  { %s702_s18 = smov 0   ;;  %s704_s19 = smov 0  }
   0x5 LB: > { %s448_s20 = sadd.s32 4294967295, %s663_s19   ;;  %s25_s21 = sadd.s32 1, %s655_s17  ;;  %s663_s19 = sphi %s704_s19, %s16_s19   ;;  %s659_s18 = sphi %s702_s18, %s864_s18   ;;  %s655_s17 = sphi %s700_s17, %s863_s17   ;;  %s651_s16 = sphi %s698_s16, %s862_s16   ;;  %s647_s15 = sphi %s696_s15, %s861_s15   ;;  %s643_s14 = sphi %s694_s14, %s860_s14   ;;  %s639_s13 = sphi %s692_s13, %s859_s13   ;;  %s635_s12 = sphi %s690_s12, %s858_s12  }
   0x6   : > { %p26_p0 = scmp.ge.s32.totalorder %s25_s21, 3  ;;  %s28_s22 = sadd.s32 1, %s659_s18 }
   0x7   : > { %s37_s23 = sadd.s32 1, %s643_s14  ;;  %p44_p1 = scmp.ne.s32.totalorder %s643_s14, %s639_s13 }
   0x8   : > { %s866_s21 = smov (%p26_p0, %s25_s21), 0  ;;  %s868_s22 = smov (!%p26_p0, %s28_s22), %s659_s18 }
   0x9   : > { %s33_s24 = ssub.s32 %s655_s17, %s866_s21  ;;  %p45_p2 = scmp.eq.s32.totalorder %s663_s19, 0 }
   0xa   : > { %p30_p3 = scmp.ge.s32.totalorder %s868_s22, 2  ;;  %p50_p4 = scmp.ne.s32.totalorder %s639_s13, %s635_s12 }
   0xb   : > { %p741_p5 = por %p45_p2, %p44_p1  ;;  %p51_p6 = scmp.eq.s32.totalorder %s448_s20, 0 }
   0xc   : > { %s870_s22 = smov (%p30_p3, %s868_s22), 0  ;;  %p495_p8 = scmp.lt.s32.totalorder %s663_s19, 6 }
   0xd   : > { %p747_p7 = por %p51_p6, %p50_p4  ;;  %s32_s27 = ssub.s32 %s659_s18, %s870_s22 }
   0xe   : > { %s34_s28 = sor.u32 %s33_s24, %s32_s27  ;;  %s150_s29 = sand.u32 1, %s643_s14  }
   0xf   : > { %p35_p9 = scmp.eq.s32.totalorder %s34_s28, 0  ;;  %s452_s30 = sshll.u32 %s150_s29, 4 }
  0x10   : > { %s453_s4 = sshll.u32 %s655_s17, 1  ;;  %s486_s6 = smul.u32 6, %s659_s18 }
  0x11   : > { %s757_s5 = scalar_select %p35_p9, %s643_s14, %s37_s23  }
  0x12   : > { %s154_s7 = scalar_lea.vmem [#allocation2], %s452_s30  ;;  %p762_p10 = pnand %p495_p8, %p741_p5 }
  0x13   : > { %s163_s8 = sshll.u32 %s154_s7, 4  ;;  %s160_s10 = sadd.s32 %s486_s6, %s453_s4  ;;  %s766_s8 = int_to_ptr.vmem [resolvable:$true] %s163_s8 }
  0x14   : > { %s454_s11 = sshll.u32 %s160_s10, 7  ;;  %s774_s23 = scalar_lea.sflag [#allocation3], %s150_s29 }
  0x15   : > { %s771_s24 = scalar_lea.hbm %s850_s0, %s454_s11  ;;  %p569_p13 = pneg %p762_p10 }
  0x16   : > { %s567_s25 = scalar_lea.hbm %s771_s24, 256  ;;  %s572_s30 = scalar_lea.hbm %s850_s0, 1536 }
  0x17   : > { %p568_p12 = scmp.ne.s32.totalorder %s771_s24, %s567_s25  ;;  %p573_p2 = scmp.lt.u32.totalorder %s771_s24, %s850_s0 }
  0x18   : > { %p574_p3 = scmp.lt.u32.totalorder %s572_s30, %s567_s25  ;;  %p576_p5 = scmp.lt.u32.totalorder %s567_s25, %s771_s24 }
  0x19   : > { %p570_p0 = pnand %p569_p13, %p568_p12 }
  0x1a   : > { %p575_p4 = por %p574_p3, %p573_p2 }
  0x1b   : > { %p571_p1 = pneg %p570_p0 }
  0x1c   : > { %p577_p6 = por %p576_p5, %p575_p4 }
  0x1e   : > { %p578_p8 = pnand %p577_p6, %p571_p1 }
  0x20   : > { %581 = shalt.err (!%p578_p8)
}
  0x21   : > { %s582_s29 = scalar_lea.vmem %s766_s8, 256  ;;  %s665_s7 = smov [#allocation2]  }
  0x22   : > { %p583_p9 = scmp.ne.s32.totalorder %s766_s8, %s582_s29  ;;  %s587_s10 = sshll.u32 %s665_s7, 4  ;;  %s588_s10 = int_to_ptr.vmem [resolvable:$false] %s587_s10 }
  0x23   : > { %s589_s11 = scalar_lea.vmem %s588_s10, 512  ;;  %p590_p11 = scmp.lt.s32.totalorder %s766_s8, %s588_s10 }
  0x24   : > { %p585_p12 = pnand %p583_p9, %p569_p13  ;;  %p591_p2 = scmp.lt.s32.totalorder %s589_s11, %s582_s29 }
  0x26   : > { %p586_p0 = pneg %p585_p12  ;;  %p592_p3 = por %p591_p2, %p590_p11 }
  0x28   : > { %p593_p4 = pnand %p592_p3, %p586_p0 }
  0x2a   : > { %596 = shalt.err (!%p593_p4)
}
  0x2b   : > { %s666_s12 = smov 128   ;;  %s667_s20 = smov 8  }
  0x2c   : > { %494 = dma.hbm_to_vmem [thread:$0]  (!%p762_p10), %s771_s24, 256, %s766_s8, %s774_s23, %s666_s12, %s666_s12, %s667_s20  }
  0x2d   : > { %p171_p13 = scmp.lt.s32.totalorder %s663_s19, 7  ;;  %p857_p1 = scmp.ge.s32.totalorder %s663_s19, 1 }
  0x2f   : > { %p172_p5 = pnand %p857_p1, %p171_p13 }
  0x30   : > { %s177_s25 = sand.u32 (!%p172_p5), 1, %s639_s13  }
  0x31   : > { %175 = sbr.rel (%p172_p5) target bundleno = 500 (0x1f4), region = 32  ;;  %s456_s27 = sshll.u32 (!%p172_p5), %s177_s25, 4 }
  0x32   : > { %s178_s28 = scalar_lea.sflag (!%p172_p5), [#allocation3], %s177_s25  ;;  %s181_s30 = scalar_lea.vmem (!%p172_p5), [#allocation2], %s456_s27 }
  0x38   : > { %630 = dma.done.wait (%p747_p7), %s178_s28, 256  }
  0x39   : > { %632 = vsyncadd (%p747_p7), %s178_s28, 4294967040  ;;  %v668_v0 = vmov 0.0   ;;  %vm669_vm0 = vmmov 0   ;;  %v564_v1 = vld [vmem:[%s852_s2] sm:$0xff]   ;;  %v219_v3 = vld [vmem:[%s181_s30 + $0x8] sm:$0xff]  ;;  %vm232_vm1 = vcmask 130048  }
  0x3a   : > { %474 = vmatprep.subr.bf16.mxu0 %v668_v0  ;;  %476 = vmatprep.mubr.msk.bf16.mxu0 %vm669_vm0, %v668_v0  ;;  %v218_v2 = vld [vmem:[%s181_s30] sm:$0xff]  ;;  %v566_v11 = vld [vmem:[%s851_s1 + $0x8] ss:$0 sps:$4 sm:$0xff]   ;;  %p208_p7 = scmp.lt.s32.totalorder %s651_s16, 1  ;;  %p210_p10 = scmp.lt.s32.totalorder %s647_s15, 2  ;;  %vm343_vm2 = vcmask 64512  }
  0x3b   : > { %475 = vmatpush3.bf16.msra.mxu0 %v564_v1  ;;  %v220_v4 = vpack.c.bf16 %v219_v3, %v218_v2  ;;  %v565_v5 = vld [vmem:[%s851_s1] sm:$0xff]  }
  0x3c   : > { %482 = vmatprep.mubr.msk.bf16.mxu1 %vm232_vm1, %v565_v5  ;;  %s872_s16 = smov (!%p208_p7, %s651_s16), 1  ;;  %s874_s15 = smov (!%p210_p10, %s647_s15), 2 }
  0x3d   : > { %s488_s6 = smul.u32 9, %s872_s16 }
  0x3e   : > { %477 = vmatmul.mubr.msk.bf16.vlgmr.msra.gmra.mrb[0].mxu0 %vm232_vm1, %v220_v4  ;;  %s487_s29 = smul.u32 3, %s874_s15 }
  0x40   : > { %s214_s7 = sadd.s32 %s488_s6, %s487_s29 }
  0x41   : > { %s457_s10 = sshll.u32 %s214_s7, 3 }
  0x42   : > { %s216_s20 = scalar_lea.vmem %s853_s3, %s457_s10 }
 0x111   : > { %v270_v6 = vpop.f32.mrb[0].mxu0 }
 0x112   : > { %v478_v7 = vpop.f32.mrb[1].mxu0 }
 0x113   : > { %v273_v8 = vpop.f32.mrb[2].mxu0 }
 0x114   : > { %v277_v9 = vpack.c.bf16 %v273_v8, %v270_v6  ;;  %v479_v10 = vpop.f32.mrb[3].mxu0 }
 0x116   : > { %480 = vmatprep.subr.bf16.mxu1 %v277_v9 }
 0x117   : > { %481 = vmatpush3.bf16.msra.mxu1 %v277_v9 }
 0x11a   : > { %483 = vmatmul.mubr.msk.bf16.vlgmr.msra.gmra.mrb[0].mxu1 %vm232_vm1, %v566_v11 }
 0x1ed   : > { %v484_v12 = vpop.f32.mrb[0].mxu1 }
 0x1ee   : > { %v466_v13 = vadd.f32 -1.0, %v484_v12  ;;  %v326_v14 = vpop.f32.mrb[1].mxu1 }
 0x1ef   : > { %v464_v15 = vadd.f32 -1.0, %v326_v14  ;;  %v485_v16 = vpop.f32.mrb[2].mxu1 }
 0x1f0   : > { %346 = vst.msk [vmem:[%s216_s20 + $0x10] sm:$0xff] %vm343_vm2, %v466_v13  ;;  %v329_v17 = vpop.f32.mrb[3].mxu1 }
 0x1f1   : > { %344 = vst.msk [vmem:[%s216_s20] sm:$0xff] %vm343_vm2, %v464_v15  ;;  %v465_v18 = vadd.f32 -1.0, %v329_v17 }
 0x1f3   : > { %345 = vst.msk [vmem:[%s216_s20 + $0x8] sm:$0xff] %vm343_vm2, %v465_v18 }
 0x1f4 PF: > { %s16_s19 = sadd.s32 1, %s663_s19   ;;  %s858_s12 = smov %s639_s13 }
 0x1f5   : > { %p13_p11 = scmp.ge.s32.totalorder %s16_s19, 8   ;;  %s859_s13 = smov %s643_s14 }
 0x1f6   : > { %s860_s14 = smov %s757_s5  ;;  %s861_s15 = smov %s655_s17 }
 0x1f7   : > { %s862_s16 = smov %s659_s18  ;;  %s863_s17 = smov %s866_s21 }
 0x1f8   : > { %s864_s18 = smov %s870_s22  ;;  %15 = sbr.rel (!%p13_p11) target bundleno = 5 (0x5), region = 72 }
 0x1ff   :  { %376 = vsyncpa [#allocation3], 1 }
 0x200   :  { %378 = vsyncpa [#allocation3 + $0x1], 1 }

</bundles_post_ra>
